<compile_context>
chip_gen: v5e
topology: v5e:2x2
jax: 0.10.0
libtpu: 0.0.40
codegen_flags: <defaults>
</compile_context>

<pallas_src>
import jax
import jax.numpy as jnp
from jax import lax
from jax.experimental import pallas as pl
from jax.experimental.pallas import tpu as pltpu


_TM_MAX = 8192            # rows of X per grid step (1 MiB f32 at K=32)
_SMALL_M_THRESHOLD = 1024  # below this, plain XLA dot beats a pallas_call launch


def _round_up(x, m):
    return ((x + m - 1) // m) * m


def _linear_t_kernel(x_ref, w_ref, b_ref, o_ref):
    # x_ref: (TM, K)  -- streamed tile of X
    # w_ref: (N, K)   -- full weight (torch nn.Linear layout), resident every step
    # b_ref: (N, 1)   -- bias column
    # o_ref: (N, TM)  -- transposed output tile (lane-dense: N sublanes x TM lanes)
    #
    # y^T = W @ x^T, expressed as an "NT" contraction over K (last axis of both
    # operands), so no big-operand reshuffle is needed and the store is lane-dense.
    acc = lax.dot_general(
        w_ref[...], x_ref[...],
        dimension_numbers=(((1,), (1,)), ((), ())),
        preferred_element_type=jnp.float32,
    )
    o_ref[...] = (acc + b_ref[...]).astype(o_ref.dtype)


def logistic_regression_forward(x_last_obsv, weight, bias, return_hidden=False,
                                use_pallas=None, tm=None):
    """Pallas equivalent of LogisticRegression.forward (eval mode).

    x_last_obsv: (B, S, D) or (M, D) float32
    weight:      (N=2, D)  -- torch nn.Linear weight layout
    bias:        (N=2,)
    use_pallas:  None = auto (XLA fallback for tiny M), True/False = force path
    tm:          optional override of the M-tile size (multiple of 128)
    """
    x = jnp.asarray(x_last_obsv)
    w = jnp.asarray(weight)          # (N, D)
    b = jnp.asarray(bias)            # (N,)

    is_3d = (x.ndim == 3)
    if is_3d:
        B, S, D = x.shape
        x2d = x.reshape(B * S, D)
    else:
        x2d = x
    M, K = x2d.shape
    N = w.shape[0]

    if use_pallas is None:
        use_pallas = M >= _SMALL_M_THRESHOLD

    if not use_pallas:
        # Tiny-problem fast path: a pallas_call launch would dominate the matmul.
        out = x2d @ w.T + b
    else:
        tm_max = _TM_MAX if tm is None else int(tm)
        TM = min(tm_max, _round_up(M, 128))
        TM = _round_up(TM, 128)                  # lane/sublane alignment for blocks
        M_pad = _round_up(M, TM)                 # no partial / OOB blocks
        x2d_p = jnp.pad(x2d, ((0, M_pad - M), (0, 0))) if M_pad != M else x2d
        b2d = b.reshape(N, 1).astype(jnp.float32)

        grid = (M_pad // TM,)
        itemsize = x2d_p.dtype.itemsize
        cost = pl.CostEstimate(
            flops=2 * M_pad * K * N,
            transcendentals=0,
            bytes_accessed=M_pad * K * itemsize + K * N * w.dtype.itemsize
                           + M_pad * N * itemsize,
        )

        out_t = pl.pallas_call(
            _linear_t_kernel,
            out_shape=jax.ShapeDtypeStruct((N, M_pad), x2d_p.dtype),
            grid=grid,
            in_specs=[
                pl.BlockSpec((TM, K), lambda i: (i, 0)),   # stream X tiles
                pl.BlockSpec((N, K), lambda i: (0, 0)),    # W resident
                pl.BlockSpec((N, 1), lambda i: (0, 0)),    # b resident
            ],
            out_specs=pl.BlockSpec((N, TM), lambda i: (0, i)),  # lane-dense output
            compiler_params=pltpu.CompilerParams(
                dimension_semantics=("parallel",)),
            cost_estimate=cost,
        )(x2d_p, w, b2d)

        # Undo the (cheap, tiny) transpose and drop padded rows in the wrapper.
        out = out_t[:, :M].T

    if is_3d:
        out = out.reshape(B, S, N)

    # Dropout: eval-mode identity (matches module.eval()).
    if return_hidden:
        return out, None
    return out


if __name__ == "__main__":
    # Shapes consistent with the module: batch=2, seq=8, input_dim=32.
    B, S, D = 2, 8, 32
    key = jax.random.PRNGKey(0)
    kx, kw, kb, kx2 = jax.random.split(key, 4)

    # Deterministic "parameter init" matching nn.Linear(input_dim, 2) shapes.
    bound = 1.0 / (D ** 0.5)
    weight = jax.random.uniform(kw, (2, D), jnp.float32, -bound, bound)
    bias = jax.random.uniform(kb, (2,), jnp.float32, -bound, bound)

    # Forward only uses X_last_obsv; X / Mask / Delta are ignored by the module.
    x_small = jax.random.normal(kx, (B, S, D), jnp.float32)
    ref_small = (x_small.reshape(-1, D) @ weight.T + bias).reshape(B, S, 2)

    # 1) Pallas path on the small demo shape (forced; auto-dispatch would use XLA here).
    y = logistic_regression_forward(x_small, weight, bias, use_pallas=True)
    y = jax.block_until_ready(y)
    assert y.shape == (B, S, 2), y.shape
    assert jnp.allclose(y, ref_small, atol=1e-4, rtol=1e-4)

    # 2) Multi-tile Pallas path with ragged M (exercises grid > 1, M padding, and
    #    the parallel grid axis): M = 4*500 = 2000 rows, TM = 256 -> 8 grid steps.
    B2, S2 = 4, 500
    x_med = jax.random.normal(kx2, (B2, S2, D), jnp.float32)
    y2, hidden = logistic_regression_forward(x_med, weight, bias,
                                             return_hidden=True,
                                             use_pallas=True, tm=256)
    y2 = jax.block_until_ready(y2)
    ref_med = (x_med.reshape(-1, D) @ weight.T + bias).reshape(B2, S2, 2)
    assert hidden is None
    assert y2.shape == (B2, S2, 2), y2.shape
    assert jnp.allclose(y2, ref_med, atol=1e-4, rtol=1e-4)

    # 3) Auto-dispatch small-input fast path (plain XLA dot).
    y3 = jax.block_until_ready(logistic_regression_forward(x_small, weight, bias))
    assert jnp.allclose(y3, ref_small, atol=1e-4, rtol=1e-4)

    print("KERNEL_OK")
</pallas_src>

<mosaic_0001>
module attributes {stable_mosaic.version = 11 : i64} {
  func.func @_linear_t_kernel(%arg0: i32, %arg1: memref<128x32xf32, #tpu.memory_space<vmem>>, %arg2: memref<2x32xf32, #tpu.memory_space<vmem>>, %arg3: memref<2x1xf32, #tpu.memory_space<vmem>>, %arg4: memref<2x128xf32, #tpu.memory_space<vmem>>) attributes {dimension_semantics = [#tpu.dimension_semantics<parallel>], iteration_bounds = array<i64: 1>, scalar_prefetch = 0 : i64, scratch_operands = 0 : i64, tpu.core_type = #tpu.core_type<tc>, window_params = [{transform_indices = @transform_0, window_bounds = array<i64: 128, 32>}, {pipeline_mode = #tpu.pipeline_mode<synchronous>, transform_indices = @transform_1, window_bounds = array<i64: 2, 32>}, {pipeline_mode = #tpu.pipeline_mode<synchronous>, transform_indices = @transform_2, window_bounds = array<i64: 2, 1>}, {transform_indices = @transform_3, window_bounds = array<i64: 2, 128>}]} {
    %c0 = arith.constant 0 : index
    %c0_0 = arith.constant 0 : index
    %0 = vector.load %arg2[%c0, %c0_0] : memref<2x32xf32, #tpu.memory_space<vmem>>, vector<2x32xf32>
    %c0_1 = arith.constant 0 : index
    %c0_2 = arith.constant 0 : index
    %1 = vector.load %arg1[%c0_1, %c0_2] : memref<128x32xf32, #tpu.memory_space<vmem>>, vector<128x32xf32>
    %cst = arith.constant dense<0.000000e+00> : vector<2x128xf32>
    %2 = tpu.matmul %0, %1, %cst {dimension_numbers = #tpu.dot_dimension_numbers<[1], [1], [0], [0], [0, 0, 1, 0], [], []>} : vector<2x32xf32>, vector<128x32xf32>, vector<2x128xf32> -> vector<2x128xf32>
    %c0_3 = arith.constant 0 : index
    %c0_4 = arith.constant 0 : index
    %3 = vector.load %arg3[%c0_3, %c0_4] : memref<2x1xf32, #tpu.memory_space<vmem>>, vector<2x1xf32>
    %4 = vector.broadcast %3 : vector<2x1xf32> to vector<2x128xf32>
    %5 = arith.addf %2, %4 : vector<2x128xf32>
    %c0_5 = arith.constant 0 : index
    %c0_6 = arith.constant 0 : index
    %6 = vector.load %arg4[%c0_5, %c0_6] : memref<2x128xf32, #tpu.memory_space<vmem>>, vector<2x128xf32>
    tpu.vector_store %arg4[%c0_5, %c0_6], %5 {strides = array<i32>} : memref<2x128xf32, #tpu.memory_space<vmem>>, vector<2x128xf32>,
    return
  }
  func.func @transform_0(%arg0: i32) -> (i32, i32) {
    %c0_i32 = arith.constant 0 : i32
    %c0_i32_0 = arith.constant 0 : i32
    return %arg0, %c0_i32 : i32, i32
  }
  func.func @transform_1(%arg0: i32) -> (i32, i32) {
    %c0_i32 = arith.constant 0 : i32
    %c0_i32_0 = arith.constant 0 : i32
    %c0_i32_1 = arith.constant 0 : i32
    return %c0_i32, %c0_i32_0 : i32, i32
  }
  func.func @transform_2(%arg0: i32) -> (i32, i32) {
    %c0_i32 = arith.constant 0 : i32
    %c0_i32_0 = arith.constant 0 : i32
    %c0_i32_1 = arith.constant 0 : i32
    return %c0_i32, %c0_i32_0 : i32, i32
  }
  func.func @transform_3(%arg0: i32) -> (i32, i32) {
    %c0_i32 = arith.constant 0 : i32
    %c0_i32_0 = arith.constant 0 : i32
    return %c0_i32, %arg0 : i32, i32
  }
}

</mosaic_0001>

<bundles_post_ra>
// kernel: tpu_custom_call.1
= control target key start
LH: loop header
LB: loop body
LE: loop exit
PB: predicated region body
PF: predicated region fallthrough
CT: control target
= control target key end

     0   :  { %vm38_vm0 = vcmask 261120   ;;  %s269_s0 = inlined_call_operand.vmem [shape: f32[128,32], index: 0, kind: input, shape index: {}]   ;;  %s270_s1 = inlined_call_operand.vmem [shape: f32[2,32], index: 1, kind: input, shape index: {}]   ;;  %s271_s2 = inlined_call_operand.vmem [shape: f32[2,1], index: 2, kind: input, shape index: {}]   ;;  %s272_s3 = inlined_call_operand.hbm [shape: f32[2,128], index: 3, kind: output, shape index: {}]  }
   0x1   :  { %v31_v0 = vld [vmem:[%s269_s0 + $0x78] sm:$0xff]  ;;  %v30_v1 = vld [vmem:[%s269_s0 + $0x70] sm:$0xff] }
   0x2   :  { %127 = vmatpush.xpose.msk.msra.mxu0 %vm38_vm0, %v31_v0 }
   0x3   :  { %8 = vsyncpa [#allocation3], 0  ;;  %v29_v2 = vld [vmem:[%s269_s0 + $0x68] sm:$0xff]  ;;  %v28_v3 = vld [vmem:[%s269_s0 + $0x60] sm:$0xff]  ;;  %v173_v10 = vmov 0   ;;  %s174_s20 = smov [#allocation2]  }
   0x4   :  { %v27_v4 = vld [vmem:[%s269_s0 + $0x58] sm:$0xff]  ;;  %v26_v5 = vld [vmem:[%s269_s0 + $0x50] sm:$0xff]  ;;  %v25_v6 = vld [vmem:[%s269_s0 + $0x48] sm:$0xff]  ;;  %146 = vset.pattern.permute.xlu0 %v173_v10  ;;  %s116_s21 = sshll.u32 %s174_s20, 4  ;;  %s118_s24 = sshll.u32 %s272_s3, 4  ;;  %s117_s21 = int_to_ptr.vmem [resolvable:$true] %s116_s21  ;;  %s119_s24 = int_to_ptr.hbm [resolvable:$true] %s118_s24 }
   0x5   :  { %v24_v7 = vld [vmem:[%s269_s0 + $0x40] sm:$0xff]  ;;  %v23_v8 = vld [vmem:[%s269_s0 + $0x38] sm:$0xff]  ;;  %v22_v11 = vld [vmem:[%s269_s0 + $0x30] sm:$0xff] }
   0x6   :  { %128 = vmatpush.xpose.msk.msra.mxu0 %vm38_vm0, %v30_v1  ;;  %v32_v9 = vld [vmem:[%s271_s2] sm:$0x3]  ;;  %v21_v12 = vld [vmem:[%s269_s0 + $0x28] sm:$0xff]  ;;  %v19_v14 = vld [vmem:[%s269_s0 + $0x18] sm:$0xff] }
   0x7   :  { %35 = vperm.xlu0 %146, %v32_v9   ;;  %v20_v13 = vld [vmem:[%s269_s0 + $0x20] sm:$0xff]  ;;  %v18_v15 = vld [vmem:[%s269_s0 + $0x10] sm:$0xff]  ;;  %v17_v16 = vld [vmem:[%s269_s0 + $0x8] sm:$0xff] }
   0x8   :  { %v16_v17 = vld [vmem:[%s269_s0] sm:$0xff] }
   0x9   :  { %v15_v18 = vld [vmem:[%s270_s1] sm:$0x3] }
   0xa   :  { %129 = vmatpush.xpose.msk.msra.mxu0 %vm38_vm0, %v29_v2 }
   0xe   :  { %130 = vmatpush.xpose.msk.msra.mxu0 %vm38_vm0, %v28_v3 }
  0x12   :  { %131 = vmatpush.xpose.msk.msra.mxu0 %vm38_vm0, %v27_v4 }
  0x16   :  { %132 = vmatpush.xpose.msk.msra.mxu0 %vm38_vm0, %v26_v5 }
  0x1a   :  { %133 = vmatpush.xpose.msk.msra.mxu0 %vm38_vm0, %v25_v6 }
  0x1e   :  { %134 = vmatpush.xpose.msk.msra.mxu0 %vm38_vm0, %v24_v7 }
  0x22   :  { %135 = vmatpush.xpose.msk.msra.mxu0 %vm38_vm0, %v23_v8 }
  0x26   :  { %136 = vmatpush.xpose.msk.msra.mxu0 %vm38_vm0, %v22_v11 }
  0x2a   :  { %137 = vmatpush.xpose.msk.msra.mxu0 %vm38_vm0, %v21_v12 }
  0x2e   :  { %138 = vmatpush.xpose.msk.msra.mxu0 %vm38_vm0, %v20_v13 }
  0x32   :  { %139 = vmatpush.xpose.msk.msra.mxu0 %vm38_vm0, %v19_v14 }
  0x36   :  { %140 = vmatpush.xpose.msk.msra.mxu0 %vm38_vm0, %v18_v15 }
  0x3a   :  { %141 = vmatpush.xpose.msk.msra.mxu0 %vm38_vm0, %v17_v16 }
  0x3e   :  { %142 = vmatpush.xpose.msk.msra.mxu0 %vm38_vm0, %v16_v17 }
  0x41   :  { %143 = vmatmul.msk.f32.vlgmr.msra.gmra.mxu0 %vm38_vm0, %v15_v18 }
  0x79   :  { %v36_v19 = vpop.permute.xlu0 %35 }
  0xbe   :  { %v107_v20 = vpop.f32.mrf.mxu0 }
  0xbf   :  { %v108_v21 = vadd.f32 %v107_v20, %v36_v19 }
  0xc1   :  { %110 = vst [vmem:[#allocation2] sm:$0x3] %v108_v21 }
  0xc2   :  { %121 = dma.vmem_to_hbm [thread:$0]  %s117_s21, 32, %s119_s24, [#allocation3]  }
  0xc3   :  { %171 = dma.done.wait [#allocation3], 32  }
  0xc4   :  { %172 = vsyncadd [#allocation3], 4294967264 }
  0xc5   :  { %126 = vsyncpa [#allocation3], 1 }

</bundles_post_ra>
